<compile_context>
chip_gen: v5e
topology: v5e:2x2
jax: 0.10.0
libtpu: 0.0.40
codegen_flags: <defaults>
</compile_context>

<pallas_src>
import jax
import jax.numpy as jnp
from jax.experimental import pallas as pl
from jax.experimental.pallas import tpu as pltpu


def _copy_kernel(x_ref, o_ref):
    # Pure copy: the BlockSpecs already select the first nc*H*W columns.
    o_ref[...] = x_ref[...]


def _make_slice_channels_kernel(nc):
    def kernel(x_ref, o_ref):
        # Block carries all C channels (full dim); keep the first nc.
        o_ref[...] = x_ref[:, :nc, :]
    return kernel


def _round_up(v, m):
    return ((v + m - 1) // m) * m


def _round_down(v, m):
    return max(m, (v // m) * m)


def _vmem_budget():
    """Generation-aware (cap, limit) in bytes."""
    try:
        phys = getattr(pltpu.get_tpu_info(), "vmem_capacity_bytes", None)
    except Exception:
        phys = None
    if phys is None:
        phys = 64 * 1024 * 1024  # assume the smallest (v7x-like) part
    if phys >= 100 * 1024 * 1024:      # v5e / v6e: 128 MiB physical
        return 96 * 1024 * 1024, 112 * 1024 * 1024
    return 32 * 1024 * 1024, 48 * 1024 * 1024  # v7x: 64 MiB physical


def first_channels(x: jax.Array, nc: int) -> jax.Array:
    """Pallas equivalent of PyTorch FirstChannels: x[:, :nc, :, :] (NCHW)."""
    N, C, H, W = x.shape
    assert 0 < nc <= C, f"nc={nc} must be in (0, {C}]"

    itemsize = jnp.dtype(x.dtype).itemsize
    HW = H * W
    row_in = C * HW    # contiguous elements per batch element in NCHW
    row_out = nc * HW  # first-nc-channel slab per batch element (contiguous)

    vmem_cap, vmem_limit = _vmem_budget()
    sublane = max(1, (8 * 4) // itemsize)        # 8 f32 / 16 bf16 / 32 int8
    total_out_bytes = N * row_out * itemsize
    cost = pl.CostEstimate(flops=0, transcendentals=0,
                           bytes_accessed=2 * total_out_bytes)

    if row_out % 128 == 0:
        # ---- Lane-dense 2D path ------------------------------------------
        # The first nc channels of an NCHW row are one contiguous slab of
        # row_out elements; flatten to 2D and copy columns [0, row_out).
        x2 = x.reshape(N, row_in)
        per_row_bytes = 4 * row_out * itemsize   # 2x-buffered in + out blocks

        if sublane * per_row_bytes > vmem_cap:
            # Single sublane-group of rows does not fit: tile the feature dim
            # too (128-aligned blocks), keep the batch block at one sublane
            # group so the batch axis can still shard across TensorCores.
            f_blk = _round_down(vmem_cap // (4 * sublane * itemsize), 128)
            f_blk = max(128, min(f_blk, row_out))
            bn = min(N, sublane)
            grid = (pl.cdiv(N, bn), pl.cdiv(row_out, f_blk))
            in_specs = [pl.BlockSpec((bn, f_blk), lambda n, f: (n, f))]
            out_specs = pl.BlockSpec((bn, f_blk), lambda n, f: (n, f))
            dims = ("parallel", "arbitrary")
        else:
            max_bn = _round_down(vmem_cap // per_row_bytes, sublane)
            # Keep >=4 grid steps on non-trivial inputs: overlaps DMA with
            # writeback and lets v7x's two TensorCores split the batch.
            if total_out_bytes > (4 << 20) and N > 1:
                max_bn = min(max_bn, _round_up(pl.cdiv(N, 4), sublane))
            bn = min(N, max_bn)   # either full N, or a multiple of sublane
            grid = (pl.cdiv(N, bn),)
            in_specs = [pl.BlockSpec((bn, row_out), lambda n: (n, 0))]
            out_specs = pl.BlockSpec((bn, row_out), lambda n: (n, 0))
            dims = ("parallel",)

        out2 = pl.pallas_call(
            _copy_kernel,
            out_shape=jax.ShapeDtypeStruct((N, row_out), x.dtype),
            grid_spec=pltpu.PrefetchScalarGridSpec(
                num_scalar_prefetch=0,
                grid=grid,
                in_specs=in_specs,
                out_specs=out_specs,
            ),
            compiler_params=pltpu.CompilerParams(
                dimension_semantics=dims,
                vmem_limit_bytes=vmem_limit,
            ),
            cost_estimate=cost,
        )(x2)
        return out2.reshape(N, nc, H, W)

    # ---- Fallback 3D path (nc*H*W not a multiple of 128) ------------------
    # Use H*W as the lane dim (full dim -> (8,128) rule satisfied and far
    # denser than W alone); bring in all C channels per block (full dim) and
    # slice the first nc in-kernel. Reads C/nc extra input bytes but stores
    # stay lane-dense on H*W.
    x3 = x.reshape(N, C, HW)
    per_row_bytes = 2 * (C * HW + nc * HW) * itemsize
    max_bn = max(1, vmem_cap // per_row_bytes)
    if total_out_bytes > (4 << 20) and N > 1:
        max_bn = min(max_bn, max(1, pl.cdiv(N, 4)))
    bn = min(N, max_bn)
    grid = (pl.cdiv(N, bn),)

    out3 = pl.pallas_call(
        _make_slice_channels_kernel(nc),
        out_shape=jax.ShapeDtypeStruct((N, nc, HW), x.dtype),
        grid_spec=pltpu.PrefetchScalarGridSpec(
            num_scalar_prefetch=0,
            grid=grid,
            in_specs=[pl.BlockSpec((bn, C, HW), lambda n: (n, 0, 0))],
            out_specs=pl.BlockSpec((bn, nc, HW), lambda n: (n, 0, 0)),
        ),
        compiler_params=pltpu.CompilerParams(
            dimension_semantics=("parallel",),
            vmem_limit_bytes=vmem_limit,
        ),
        cost_estimate=cost,
    )(x3)
    return out3.reshape(N, nc, H, W)


if __name__ == "__main__":
    key = jax.random.PRNGKey(0)

    # Main case (matches the module usage): lane-dense path (3*16*16 = 768 % 128 == 0).
    N, C, H, W = 2, 4, 16, 16
    nc = 3  # FirstChannels(nc=3)
    x = jax.random.normal(key, (N, C, H, W), dtype=jnp.float32)

    out = jax.block_until_ready(first_channels(x, nc))
    ref = x[:, :nc, :, :]
    assert out.shape == (N, nc, H, W), out.shape
    assert jnp.array_equal(out, ref), "mismatch vs reference slice (lane-dense path)"

    # Fallback path check: nc*H*W = 3*8*12 = 288 is not a multiple of 128.
    x2 = jax.random.normal(jax.random.PRNGKey(1), (2, 4, 8, 12), dtype=jnp.float32)
    out2 = jax.block_until_ready(first_channels(x2, 3))
    assert jnp.array_equal(out2, x2[:, :3, :, :]), "mismatch vs reference slice (fallback path)"

    print("KERNEL_OK")
</pallas_src>

<mosaic_0001>
module attributes {stable_mosaic.version = 11 : i64} {
  func.func @_copy_kernel(%arg0: i32, %arg1: memref<2x768xf32, #tpu.memory_space<vmem>>, %arg2: memref<2x768xf32, #tpu.memory_space<vmem>>) attributes {dimension_semantics = [#tpu.dimension_semantics<parallel>], iteration_bounds = array<i64: 1>, scalar_prefetch = 0 : i64, scratch_operands = 0 : i64, tpu.core_type = #tpu.core_type<tc>, window_params = [{transform_indices = @transform_0, window_bounds = array<i64: 2, 768>}, {transform_indices = @transform_1, window_bounds = array<i64: 2, 768>}]} {
    %c0 = arith.constant 0 : index
    %c0_0 = arith.constant 0 : index
    %0 = vector.load %arg1[%c0, %c0_0] : memref<2x768xf32, #tpu.memory_space<vmem>>, vector<2x768xf32>
    %c0_1 = arith.constant 0 : index
    %c0_2 = arith.constant 0 : index
    %1 = vector.load %arg2[%c0_1, %c0_2] : memref<2x768xf32, #tpu.memory_space<vmem>>, vector<2x768xf32>
    tpu.vector_store %arg2[%c0_1, %c0_2], %0 {strides = array<i32>} : memref<2x768xf32, #tpu.memory_space<vmem>>, vector<2x768xf32>,
    return
  }
  func.func @transform_0(%arg0: i32) -> (i32, i32) {
    %c0_i32 = arith.constant 0 : i32
    %c0_i32_0 = arith.constant 0 : i32
    return %arg0, %c0_i32 : i32, i32
  }
  func.func @transform_1(%arg0: i32) -> (i32, i32) {
    %c0_i32 = arith.constant 0 : i32
    %c0_i32_0 = arith.constant 0 : i32
    return %arg0, %c0_i32 : i32, i32
  }
}

</mosaic_0001>

<bundles_post_ra>
// kernel: tpu_custom_call.1
= control target key start
LH: loop header
LB: loop body
LE: loop exit
PB: predicated region body
PF: predicated region fallthrough
CT: control target
= control target key end

     0   :  { %6 = vsyncpa [#allocation3], 0  ;;  %s116_s0 = inlined_call_operand.hbm [shape: f32[2,1024], index: 0, kind: input, shape index: {}]   ;;  %s117_s1 = inlined_call_operand.hbm [shape: f32[2,768], index: 1, kind: output, shape index: {}]  }
   0x1   :  { %7 = vsyncpa [#allocation4], 0  ;;  %s13_s8 = sshll.u32 %s116_s0, 4  ;;  %s98_s9 = smov [#allocation2]   ;;  %s14_s8 = int_to_ptr.hbm [resolvable:$true] %s13_s8 }
   0x2   :  { %s15_s10 = sshll.u32 %s98_s9, 4  ;;  %s16_s10 = int_to_ptr.vmem [resolvable:$true] %s15_s10 }
   0x3   :  { %18 = dma.hbm_to_vmem [thread:$0]  %s14_s8, 192, %s16_s10, [#allocation3]  }
   0x4   :  { %94 = dma.done.wait [#allocation3], 192  }
   0x5   :  { %95 = vsyncadd [#allocation3], 4294967104  ;;  %s99_s11 = smov [#allocation5]   ;;  %s34_s15 = sshll.u32 %s117_s1, 4  ;;  %v23_v0 = vld [vmem:[#allocation2] sm:$0xff]  ;;  %s35_s15 = int_to_ptr.hbm [resolvable:$true] %s34_s15 }
   0x6   :  { %s32_s12 = sshll.u32 %s99_s11, 4  ;;  %v24_v1 = vld [vmem:[#allocation2 + $0x8] sm:$0xf]  ;;  %25 = vst [vmem:[#allocation5] sm:$0xff] %v23_v0  ;;  %s33_s12 = int_to_ptr.vmem [resolvable:$true] %s32_s12 }
   0x7   :  { %26 = vst [vmem:[#allocation5 + $0x8] sm:$0xf] %v24_v1 }
   0x8   :  { %37 = dma.vmem_to_hbm [thread:$0]  %s33_s12, 192, %s35_s15, [#allocation4]  }
   0x9   :  { %96 = dma.done.wait [#allocation4], 192  }
   0xa   :  { %97 = vsyncadd [#allocation4], 4294967104 }
   0xb   :  { %42 = vsyncpa [#allocation3], 1 }
   0xc   :  { %43 = vsyncpa [#allocation4], 1 }

</bundles_post_ra>
